<compile_context>
chip_gen: v6e
topology: v6e:2x2x1
jax: 0.10.0
libtpu: 0.0.40
codegen_flags: <defaults>
</compile_context>

<pallas_src>
import math

import jax
import jax.numpy as jnp
from jax.experimental import pallas as pl
from jax.experimental.pallas import tpu as pltpu


def _round_up(x, m):
    return (x + m - 1) // m * m


def actor_kernel(x_ref, w1_ref, b1_ref, w2_ref, b2_ref, w3_ref, b3_ref, o_ref):
    # x arrives as raw f32; cast to bf16 on-chip (VPU) for the MXU.
    x = x_ref[...].astype(w1_ref.dtype)
    # fc1 + ReLU (bf16 operands, f32 accumulate, f32 elementwise)
    h1 = jnp.dot(x, w1_ref[...], preferred_element_type=jnp.float32)
    h1 = jnp.maximum(h1 + b1_ref[...], 0.0)
    # fc2 + ReLU
    h2 = jnp.dot(h1.astype(w2_ref.dtype), w2_ref[...],
                 preferred_element_type=jnp.float32)
    h2 = jnp.maximum(h2 + b2_ref[...], 0.0)
    # fc3 + softmax (numerically stable, over last axis).  Padded action lanes
    # carry a -inf bias, so exp(.) == 0 there and they never affect max / sum.
    logits = jnp.dot(h2.astype(w3_ref.dtype), w3_ref[...],
                     preferred_element_type=jnp.float32)
    logits = logits + b3_ref[...]
    m = jnp.max(logits, axis=-1, keepdims=True)
    e = jnp.exp(logits - m)
    s = jnp.sum(e, axis=-1, keepdims=True)
    inv = pl.reciprocal(s, approx=True)          # EUP slot
    inv = inv * (2.0 - s * inv)                  # one Newton step: near-exact norm
    o_ref[...] = (e * inv).astype(o_ref.dtype)


def prepare_actor_params(w1, b1, w2, b2, w3, b3, *, mxu_dtype=jnp.bfloat16):
    """One-time prep (hoisted out of the per-call path).

    w*: [in, out], b*: [out] or [1, out].  Pads the action dim to a lane-dense
    multiple of 128 (padded logit lanes get a -inf bias) and casts MXU operands
    to bf16; biases stay f32.
    """
    A = w3.shape[1]
    Ap = _round_up(A, 128)
    H = w1.shape[1]

    w1_p = w1.astype(mxu_dtype)
    w2_p = w2.astype(mxu_dtype)
    w3_p = jnp.zeros((w3.shape[0], Ap), mxu_dtype).at[:, :A].set(
        w3.astype(mxu_dtype))
    b1_p = jnp.asarray(b1, jnp.float32).reshape(1, H)
    b2_p = jnp.asarray(b2, jnp.float32).reshape(1, H)
    b3_p = jnp.full((1, Ap), -jnp.inf, jnp.float32).at[:, :A].set(
        jnp.asarray(b3, jnp.float32).reshape(1, A))
    return (w1_p, b1_p, w2_p, b2_p, w3_p, b3_p, A)


def _choose_tb(B, max_tb):
    """Batch tile: >=2 balanced tiles (v7x megacore), multiple of 8 sublanes,
    capped at max_tb, with <8 rows of padding waste per tile."""
    n_tiles = max(2, pl.cdiv(B, max_tb))
    if n_tiles % 2:
        n_tiles += 1
    return max(8, _round_up(pl.cdiv(B, n_tiles), 8))


def actor_forward(x, params, *, max_tb=1024, out_dtype=jnp.float32,
                  return_padded=False):
    """x: [B, D] f32, params: output of prepare_actor_params.

    Returns [B, A] probabilities (or [B, Ap] if return_padded=True; padded
    lanes are exactly 0).
    """
    w1_p, b1_p, w2_p, b2_p, w3_p, b3_p, A = params
    B, D = x.shape
    H = w1_p.shape[1]
    Ap = w3_p.shape[1]
    assert w1_p.shape[0] == D, "x feature dim must match fc1 input dim"

    TB = _choose_tb(B, max_tb)
    grid = (pl.cdiv(B, TB),)

    out = pl.pallas_call(
        actor_kernel,
        out_shape=jax.ShapeDtypeStruct((B, Ap), out_dtype),
        grid=grid,
        in_specs=[
            pl.BlockSpec((TB, D), lambda i: (i, 0)),    # x: tiled over batch (raw f32)
            pl.BlockSpec((D, H), lambda i: (0, 0)),     # W1: resident
            pl.BlockSpec((1, H), lambda i: (0, 0)),     # b1: resident
            pl.BlockSpec((H, H), lambda i: (0, 0)),     # W2: resident
            pl.BlockSpec((1, H), lambda i: (0, 0)),     # b2: resident
            pl.BlockSpec((H, Ap), lambda i: (0, 0)),    # W3: resident
            pl.BlockSpec((1, Ap), lambda i: (0, 0)),    # b3: resident
        ],
        out_specs=pl.BlockSpec((TB, Ap), lambda i: (i, 0)),
        compiler_params=pltpu.CompilerParams(
            dimension_semantics=("parallel",),
            vmem_limit_bytes=32 * 1024 * 1024),
    )(x, w1_p, b1_p, w2_p, b2_p, w3_p, b3_p)

    if return_padded:
        return out
    return out[:, :A]


def xavier_uniform(key, fan_in, fan_out):
    # Matches torch.nn.init.xavier_uniform_ (gain=1.0); stored as [in, out].
    limit = math.sqrt(6.0 / (fan_in + fan_out))
    return jax.random.uniform(key, (fan_in, fan_out), jnp.float32, -limit, limit)


def linear_bias(key, fan_in, fan_out):
    # torch.nn.Linear default bias init: U(-1/sqrt(fan_in), 1/sqrt(fan_in)).
    bound = 1.0 / math.sqrt(fan_in)
    return jax.random.uniform(key, (1, fan_out), jnp.float32, -bound, bound)


def _reference(x, w1, b1, w2, b2, w3, b3, mxu_dtype=jnp.bfloat16):
    # Pure-JAX reference with the same bf16-operand / f32-accumulate recipe.
    # (Intentionally diverges from a pure-f32 PyTorch Actor by ~bf16 epsilon.)
    h1 = jnp.maximum(
        jnp.dot(x.astype(mxu_dtype), w1.astype(mxu_dtype),
                preferred_element_type=jnp.float32) + b1, 0.0)
    h2 = jnp.maximum(
        jnp.dot(h1.astype(mxu_dtype), w2.astype(mxu_dtype),
                preferred_element_type=jnp.float32) + b2, 0.0)
    logits = jnp.dot(h2.astype(mxu_dtype), w3.astype(mxu_dtype),
                     preferred_element_type=jnp.float32) + b3
    return jax.nn.softmax(logits, axis=-1)


if __name__ == "__main__":
    # Config consistent with the module:
    #   args.obs_shape = 8  -> image_dims = 8*8*3 + 4 = 196
    #   args.action_shape = 5, hidden_nodes = 128
    obs_shape = 8
    image_dims = obs_shape * obs_shape * 3 + 4  # 196
    hidden = 128
    action_shape = 5

    key = jax.random.PRNGKey(0)
    kx, kx2, k1, k2, k3, kb1, kb2, kb3 = jax.random.split(key, 8)

    w1 = xavier_uniform(k1, image_dims, hidden)
    b1 = linear_bias(kb1, image_dims, hidden)
    w2 = xavier_uniform(k2, hidden, hidden)
    b2 = linear_bias(kb2, hidden, hidden)
    w3 = xavier_uniform(k3, hidden, action_shape)
    b3 = linear_bias(kb3, hidden, action_shape)

    # One-time param prep (hoisted out of the per-call path).
    params = jax.block_until_ready(
        prepare_actor_params(w1, b1, w2, b2, w3, b3)[:-1]
    ) + (action_shape,)

    # --- small batch (B=2): single ragged grid step (block rows > batch) ---
    x_small = jax.random.normal(kx, (2, image_dims), jnp.float32)
    out_small = jax.block_until_ready(actor_forward(x_small, params))
    ref_small = _reference(x_small, w1, b1, w2, b2, w3, b3)
    assert out_small.shape == (2, action_shape)
    assert jnp.allclose(out_small, ref_small, atol=5e-3, rtol=5e-3)
    assert jnp.allclose(jnp.sum(out_small, axis=-1), 1.0, atol=5e-3)

    # --- larger batch (B=300): two balanced 152-row tiles (grid=(2,)) ---
    x_big = jax.random.normal(kx2, (300, image_dims), jnp.float32)
    out_big = jax.block_until_ready(actor_forward(x_big, params))
    ref_big = _reference(x_big, w1, b1, w2, b2, w3, b3)
    assert out_big.shape == (300, action_shape)
    assert jnp.allclose(out_big, ref_big, atol=5e-3, rtol=5e-3)
    assert jnp.allclose(jnp.sum(out_big, axis=-1), 1.0, atol=5e-3)

    # --- low-writeback path: bf16 probs, padded [B, 128] output (lanes >=5 are 0) ---
    out_pad = jax.block_until_ready(
        actor_forward(x_big, params, out_dtype=jnp.bfloat16, return_padded=True))
    assert out_pad.shape == (300, 128)
    assert jnp.allclose(out_pad[:, :action_shape].astype(jnp.float32),
                        ref_big, atol=2e-2, rtol=2e-2)
    assert jnp.all(out_pad[:, action_shape:] == 0)

    print("KERNEL_OK")
</pallas_src>

<mosaic_0001>
module attributes {stable_mosaic.version = 11 : i64} {
  func.func @actor_kernel(%arg0: i32, %arg1: memref<8x196xf32, #tpu.memory_space<vmem>>, %arg2: memref<196x128xbf16, #tpu.memory_space<vmem>>, %arg3: memref<1x128xf32, #tpu.memory_space<vmem>>, %arg4: memref<128x128xbf16, #tpu.memory_space<vmem>>, %arg5: memref<1x128xf32, #tpu.memory_space<vmem>>, %arg6: memref<128x128xbf16, #tpu.memory_space<vmem>>, %arg7: memref<1x128xf32, #tpu.memory_space<vmem>>, %arg8: memref<8x128xf32, #tpu.memory_space<vmem>>) attributes {dimension_semantics = [#tpu.dimension_semantics<parallel>], iteration_bounds = array<i64: 1>, scalar_prefetch = 0 : i64, scratch_operands = 0 : i64, tpu.core_type = #tpu.core_type<tc>, window_params = [{transform_indices = @transform_0, window_bounds = array<i64: 8, 196>}, {pipeline_mode = #tpu.pipeline_mode<synchronous>, transform_indices = @transform_1, window_bounds = array<i64: 196, 128>}, {pipeline_mode = #tpu.pipeline_mode<synchronous>, transform_indices = @transform_2, window_bounds = array<i64: 1, 128>}, {pipeline_mode = #tpu.pipeline_mode<synchronous>, transform_indices = @transform_3, window_bounds = array<i64: 128, 128>}, {pipeline_mode = #tpu.pipeline_mode<synchronous>, transform_indices = @transform_4, window_bounds = array<i64: 1, 128>}, {pipeline_mode = #tpu.pipeline_mode<synchronous>, transform_indices = @transform_5, window_bounds = array<i64: 128, 128>}, {pipeline_mode = #tpu.pipeline_mode<synchronous>, transform_indices = @transform_6, window_bounds = array<i64: 1, 128>}, {transform_indices = @transform_7, window_bounds = array<i64: 8, 128>}]} {
    %c0 = arith.constant 0 : index
    %c0_0 = arith.constant 0 : index
    %0 = vector.load %arg1[%c0, %c0_0] : memref<8x196xf32, #tpu.memory_space<vmem>>, vector<8x196xf32>
    %1 = arith.truncf %0 : vector<8x196xf32> to vector<8x196xbf16>
    %c0_1 = arith.constant 0 : index
    %c0_2 = arith.constant 0 : index
    %2 = vector.load %arg2[%c0_1, %c0_2] : memref<196x128xbf16, #tpu.memory_space<vmem>>, vector<196x128xbf16>
    %cst = arith.constant dense<0.000000e+00> : vector<8x128xf32>
    %3 = tpu.matmul %1, %2, %cst {dimension_numbers = #tpu.dot_dimension_numbers<[1], [0], [0], [1], [0, 0, 1, 1], [], []>} : vector<8x196xbf16>, vector<196x128xbf16>, vector<8x128xf32> -> vector<8x128xf32>
    %c0_3 = arith.constant 0 : index
    %c0_4 = arith.constant 0 : index
    %4 = vector.load %arg3[%c0_3, %c0_4] : memref<1x128xf32, #tpu.memory_space<vmem>>, vector<1x128xf32>
    %5 = vector.broadcast %4 : vector<1x128xf32> to vector<8x128xf32>
    %6 = arith.addf %3, %5 : vector<8x128xf32>
    %cst_5 = arith.constant 0.000000e+00 : f32
    %7 = vector.broadcast %cst_5 : f32 to vector<8x128xf32>
    %8 = arith.maximumf %6, %7 : vector<8x128xf32>
    %9 = arith.truncf %8 : vector<8x128xf32> to vector<8x128xbf16>
    %c0_6 = arith.constant 0 : index
    %c0_7 = arith.constant 0 : index
    %10 = vector.load %arg4[%c0_6, %c0_7] : memref<128x128xbf16, #tpu.memory_space<vmem>>, vector<128x128xbf16>
    %cst_8 = arith.constant dense<0.000000e+00> : vector<8x128xf32>
    %11 = tpu.matmul %9, %10, %cst_8 {dimension_numbers = #tpu.dot_dimension_numbers<[1], [0], [0], [1], [0, 0, 1, 1], [], []>} : vector<8x128xbf16>, vector<128x128xbf16>, vector<8x128xf32> -> vector<8x128xf32>
    %c0_9 = arith.constant 0 : index
    %c0_10 = arith.constant 0 : index
    %12 = vector.load %arg5[%c0_9, %c0_10] : memref<1x128xf32, #tpu.memory_space<vmem>>, vector<1x128xf32>
    %13 = vector.broadcast %12 : vector<1x128xf32> to vector<8x128xf32>
    %14 = arith.addf %11, %13 : vector<8x128xf32>
    %cst_11 = arith.constant 0.000000e+00 : f32
    %15 = vector.broadcast %cst_11 : f32 to vector<8x128xf32>
    %16 = arith.maximumf %14, %15 : vector<8x128xf32>
    %17 = arith.truncf %16 : vector<8x128xf32> to vector<8x128xbf16>
    %c0_12 = arith.constant 0 : index
    %c0_13 = arith.constant 0 : index
    %18 = vector.load %arg6[%c0_12, %c0_13] : memref<128x128xbf16, #tpu.memory_space<vmem>>, vector<128x128xbf16>
    %cst_14 = arith.constant dense<0.000000e+00> : vector<8x128xf32>
    %19 = tpu.matmul %17, %18, %cst_14 {dimension_numbers = #tpu.dot_dimension_numbers<[1], [0], [0], [1], [0, 0, 1, 1], [], []>} : vector<8x128xbf16>, vector<128x128xbf16>, vector<8x128xf32> -> vector<8x128xf32>
    %c0_15 = arith.constant 0 : index
    %c0_16 = arith.constant 0 : index
    %20 = vector.load %arg7[%c0_15, %c0_16] : memref<1x128xf32, #tpu.memory_space<vmem>>, vector<1x128xf32>
    %21 = vector.broadcast %20 : vector<1x128xf32> to vector<8x128xf32>
    %22 = arith.addf %19, %21 : vector<8x128xf32>
    %cst_17 = arith.constant dense<0xFF800000> : vector<8xf32>
    %23 = vector.multi_reduction <maximumf>, %22, %cst_17 [1] : vector<8x128xf32> to vector<8xf32>
    %24 = vector.shape_cast %23 : vector<8xf32> to vector<8x1xf32>
    %25 = vector.broadcast %24 : vector<8x1xf32> to vector<8x128xf32>
    %26 = arith.subf %22, %25 : vector<8x128xf32>
    %27 = math.exp %26 : vector<8x128xf32>
    %cst_18 = arith.constant dense<0.000000e+00> : vector<8xf32>
    %28 = vector.multi_reduction <add>, %27, %cst_18 [1] : vector<8x128xf32> to vector<8xf32>
    %29 = vector.shape_cast %28 : vector<8xf32> to vector<8x1xf32>
    %30 = tpu.reciprocal %29 {approx = true} : vector<8x1xf32> -> vector<8x1xf32>
    %31 = arith.mulf %29, %30 : vector<8x1xf32>
    %cst_19 = arith.constant 2.000000e+00 : f32
    %32 = vector.broadcast %cst_19 : f32 to vector<8x1xf32>
    %33 = arith.subf %32, %31 : vector<8x1xf32>
    %34 = arith.mulf %30, %33 : vector<8x1xf32>
    %35 = vector.broadcast %34 : vector<8x1xf32> to vector<8x128xf32>
    %36 = arith.mulf %27, %35 : vector<8x128xf32>
    %c0_20 = arith.constant 0 : index
    %c0_21 = arith.constant 0 : index
    %37 = vector.load %arg8[%c0_20, %c0_21] : memref<8x128xf32, #tpu.memory_space<vmem>>, vector<8x128xf32>
    tpu.vector_store %arg8[%c0_20, %c0_21], %36 {strides = array<i32>} : memref<8x128xf32, #tpu.memory_space<vmem>>, vector<8x128xf32>,
    return
  }
  func.func @transform_0(%arg0: i32) -> (i32, i32) {
    %c0_i32 = arith.constant 0 : i32
    %c0_i32_0 = arith.constant 0 : i32
    return %arg0, %c0_i32 : i32, i32
  }
  func.func @transform_1(%arg0: i32) -> (i32, i32) {
    %c0_i32 = arith.constant 0 : i32
    %c0_i32_0 = arith.constant 0 : i32
    %c0_i32_1 = arith.constant 0 : i32
    return %c0_i32, %c0_i32_0 : i32, i32
  }
  func.func @transform_2(%arg0: i32) -> (i32, i32) {
    %c0_i32 = arith.constant 0 : i32
    %c0_i32_0 = arith.constant 0 : i32
    %c0_i32_1 = arith.constant 0 : i32
    return %c0_i32, %c0_i32_0 : i32, i32
  }
  func.func @transform_3(%arg0: i32) -> (i32, i32) {
    %c0_i32 = arith.constant 0 : i32
    %c0_i32_0 = arith.constant 0 : i32
    %c0_i32_1 = arith.constant 0 : i32
    return %c0_i32, %c0_i32_0 : i32, i32
  }
  func.func @transform_4(%arg0: i32) -> (i32, i32) {
    %c0_i32 = arith.constant 0 : i32
    %c0_i32_0 = arith.constant 0 : i32
    %c0_i32_1 = arith.constant 0 : i32
    return %c0_i32, %c0_i32_0 : i32, i32
  }
  func.func @transform_5(%arg0: i32) -> (i32, i32) {
    %c0_i32 = arith.constant 0 : i32
    %c0_i32_0 = arith.constant 0 : i32
    %c0_i32_1 = arith.constant 0 : i32
    return %c0_i32, %c0_i32_0 : i32, i32
  }
  func.func @transform_6(%arg0: i32) -> (i32, i32) {
    %c0_i32 = arith.constant 0 : i32
    %c0_i32_0 = arith.constant 0 : i32
    %c0_i32_1 = arith.constant 0 : i32
    return %c0_i32, %c0_i32_0 : i32, i32
  }
  func.func @transform_7(%arg0: i32) -> (i32, i32) {
    %c0_i32 = arith.constant 0 : i32
    %c0_i32_0 = arith.constant 0 : i32
    return %arg0, %c0_i32 : i32, i32
  }
}

</mosaic_0001>

<bundles_post_ra>
// kernel: tpu_custom_call.1
= control target key start
LH: loop header
LB: loop body
LE: loop exit
PB: predicated region body
PF: predicated region fallthrough
CT: control target
= control target key end

     0   :  { %12 = vsyncpa [#allocation3], 0  ;;  %s894_s0 = inlined_call_operand.hbm [shape: f32[2,196], index: 0, kind: input, shape index: {}]   ;;  %s895_s1 = inlined_call_operand.hbm [shape: bf16[196,128], index: 1, kind: input, shape index: {}]   ;;  %s896_s2 = inlined_call_operand.vmem [shape: f32[1,128], index: 2, kind: input, shape index: {}]   ;;  %s897_s3 = inlined_call_operand.hbm [shape: bf16[128,128], index: 3, kind: input, shape index: {}]   ;;  %s898_s4 = inlined_call_operand.vmem [shape: f32[1,128], index: 4, kind: input, shape index: {}]   ;;  %s899_s5 = inlined_call_operand.hbm [shape: bf16[128,128], index: 5, kind: input, shape index: {}]   ;;  %s900_s6 = inlined_call_operand.vmem [shape: f32[1,128], index: 6, kind: input, shape index: {}]   ;;  %s901_s7 = inlined_call_operand.hbm [shape: f32[2,128], index: 7, kind: output, shape index: {}]  }
   0x1   :  { %13 = vsyncpa [#allocation6], 0 }
   0x2   :  { %14 = vsyncpa [#allocation9], 0 }
   0x3   :  { %15 = vsyncpa [#allocation4], 0 }
   0x4   :  { %20 = vsyncadd [#allocation3], 192  ;;  %s775_s24 = smov [#allocation5]   ;;  %s776_s26 = smov [#allocation2]  }
   0x5   :  { %s33_s25 = sshll.u32 %s775_s24, 4  ;;  %s21_s27 = sshll.u32 %s776_s26, 4  ;;  %s34_s25 = int_to_ptr.vmem [resolvable:$true] %s33_s25  ;;  %s22_s27 = int_to_ptr.vmem [resolvable:$true] %s21_s27 }
   0x6   :  { %s675_s28 = scalar_lea.vmem %s34_s25, 1600  ;;  %p680_p1 = scmp.lt.s32.totalorder %s34_s25, %s34_s25 }
   0x7   :  { %p676_p0 = scmp.ne.s32.totalorder %s34_s25, %s675_s28  ;;  %p681_p2 = scmp.lt.s32.totalorder %s675_s28, %s675_s28 }
   0x9   :  { %p682_p3 = por %p681_p2, %p680_p1 }
   0xb   :  { %p683_p4 = pnand %p682_p3, %p676_p0 }
   0xd   :  { %686 = shalt.err (!%p683_p4)
}
   0xe   :  { %s777_s29 = smov 64   ;;  %s778_s30 = smov 4  }
   0xf   :  { %39 = dma.hbm_to_vmem [thread:$0]  %s895_s1, 1600, %s34_s25, [#allocation6], %s777_s29, %s777_s29, %s778_s30  }
  0x10   :  { %s695_s10 = scalar_lea.vmem %s22_s27, 64  ;;  %s699_s11 = scalar_lea.vmem %s22_s27, 256 }
  0x11   :  { %p696_p5 = scmp.ne.s32.totalorder %s22_s27, %s695_s10  ;;  %p700_p6 = scmp.lt.s32.totalorder %s22_s27, %s22_s27 }
  0x12   :  { %p701_p7 = scmp.lt.s32.totalorder %s699_s11, %s695_s10 }
  0x14   :  { %p702_p8 = por %p701_p7, %p700_p6 }
  0x16   :  { %p703_p9 = pnand %p702_p8, %p696_p5 }
  0x18   :  { %706 = shalt.err (!%p703_p9)
}
  0x19   :  { %27 = dma.hbm_to_vmem [thread:$0]  %s894_s0, 64, %s22_s27, [#allocation3], %s777_s29, %s777_s29, %s778_s30  }
  0x1a   :  { %s779_s14 = smov [#allocation7]   ;;  %s780_s16 = smov [#allocation8]  }
  0x1b   :  { %s47_s15 = sshll.u32 %s779_s14, 4  ;;  %s61_s17 = sshll.u32 %s780_s16, 4  ;;  %s48_s15 = int_to_ptr.vmem [resolvable:$true] %s47_s15  ;;  %s62_s17 = int_to_ptr.vmem [resolvable:$true] %s61_s17 }
  0x1c   :  { %s715_s1 = scalar_lea.vmem %s48_s15, 1024  ;;  %p720_p11 = scmp.lt.s32.totalorder %s48_s15, %s48_s15 }
  0x1d   :  { %p716_p10 = scmp.ne.s32.totalorder %s48_s15, %s715_s1  ;;  %p721_p12 = scmp.lt.s32.totalorder %s715_s1, %s715_s1 }
  0x1f   :  { %p722_p13 = por %p721_p12, %p720_p11 }
  0x21   :  { %p723_p0 = pnand %p722_p13, %p716_p10 }
  0x23   :  { %726 = shalt.err (!%p723_p0)
}
  0x24   :  { %53 = dma.hbm_to_vmem [thread:$0]  %s897_s3, 1024, %s48_s15, [#allocation6], %s777_s29, %s777_s29, %s778_s30  }
  0x25   :  { %s735_s0 = scalar_lea.vmem %s62_s17, 1024  ;;  %p740_p2 = scmp.lt.s32.totalorder %s62_s17, %s62_s17 }
  0x26   :  { %p736_p1 = scmp.ne.s32.totalorder %s62_s17, %s735_s0  ;;  %p741_p3 = scmp.lt.s32.totalorder %s735_s0, %s735_s0 }
  0x28   :  { %p742_p4 = por %p741_p3, %p740_p2 }
  0x2a   :  { %p743_p5 = pnand %p742_p4, %p736_p1 }
  0x2c   :  { %746 = shalt.err (!%p743_p5)
}
  0x2d   :  { %67 = dma.hbm_to_vmem [thread:$0]  %s899_s5, 1024, %s62_s17, [#allocation9], %s777_s29, %s777_s29, %s778_s30  }
  0x2e   :  { %767 = dma.done.wait [#allocation3], 256  }
  0x2f   :  { %768 = vsyncadd [#allocation3], 4294967040 }
  0x30   :  { %769 = dma.done.wait [#allocation6], 2624  }
  0x31   :  { %770 = vsyncadd [#allocation6], 4294964672 }
  0x32   :  { %771 = dma.done.wait [#allocation9], 1024  }
  0x33   :  { %772 = vsyncadd [#allocation9], 4294966272  ;;  %v781_v0 = vmov 0   ;;  %v782_v1 = vmov 0.0   ;;  %v630_v2 = vld [vmem:[#allocation5 + $0x38] sm:$0xff]   ;;  %v631_v3 = vld [vmem:[#allocation5 + $0x30] sm:$0xff]  }
  0x34   :  { %228 = vmatprep.subr.bf16.mxu0 %v781_v0  ;;  %577 = vmatprep.subr.bf16.mxu1 %v782_v1  ;;  %v632_v4 = vld [vmem:[#allocation5 + $0x28] sm:$0xff]   ;;  %v633_v5 = vld [vmem:[#allocation5 + $0x20] sm:$0xff]   ;;  %v634_v6 = vld [vmem:[#allocation5 + $0x18] sm:$0xff]   ;;  %vm220_vm0 = vcmask 556032   ;;  %vm224_vm1 = vcmask 1041408   ;;  %vm783_vm2 = vmmov 0  }
  0x35   :  { %229 = vmatpush1.bf16.msra.mxu0 %v630_v2  ;;  %v665_v7 = vld.sshfl [vmem:[#allocation2] sm:$0xff pattern:$0x76325410]  ;;  %v666_v8 = vld.sshfl [vmem:[#allocation2 + $0x8] sm:$0xff pattern:$0x76325410]  ;;  %593 = vmatprep.mubr.msk.bf16.mxu1 %vm783_vm2, %v782_v1 }
  0x36   :  { %230 = vmatprep.subr.bf16.mxu0 %v781_v0  ;;  %v645_v9 = vld [vmem:[#allocation7 + $0x38] sm:$0xff]   ;;  %v646_v10 = vld [vmem:[#allocation7 + $0x30] sm:$0xff]   ;;  %v108_v12 = vcombine.high %v665_v7, %v666_v8  ;;  %v636_v13 = vld [vmem:[#allocation5 + $0x8] sm:$0xff]   ;;  %v107_v25 = vcombine.low %v665_v7, %v666_v8 }
  0x37   :  { %578 = vmatpush3.bf16.msra.mxu1 %v645_v9  ;;  %v635_v11 = vld [vmem:[#allocation5 + $0x10] sm:$0xff]   ;;  %v648_v16 = vld [vmem:[#allocation7 + $0x20] sm:$0xff]   ;;  %v638_v18 = vld [vmem:[#allocation5 + $0x60] ss:$0 sps:$4 sm:$0x33]  }
  0x38   :  { %579 = vmatprep.subr.bf16.mxu1 %v782_v1  ;;  %v112_v14 = vpack.c.bf16 %v108_v12, %v108_v12  ;;  %v647_v15 = vld [vmem:[#allocation7 + $0x28] sm:$0xff]   ;;  %v637_v17 = vld [vmem:[#allocation5] sm:$0xff]   ;;  %v226_v20 = vsel %vm224_vm1, %v638_v18, 0  ;;  %v650_v21 = vld [vmem:[#allocation7 + $0x10] sm:$0xff]   ;;  %v111_v27 = vpack.c.bf16 %v107_v25, %v107_v25 }
  0x39   :  { %231 = vmatpush1.bf16.msra.mxu0 %v631_v3  ;;  %v649_v19 = vld [vmem:[#allocation7 + $0x18] sm:$0xff]   ;;  %v640_v23 = vld [vmem:[#allocation5 + $0x50] sm:$0xff]   ;;  %v641_v24 = vld [vmem:[#allocation5 + $0x48] sm:$0xff]  }
  0x3a   :  { %232 = vmatprep.subr.bf16.mxu0 %v781_v0  ;;  %540 = vmatprep.mubr.msk.bf16.mxu0 %vm220_vm0, %v112_v14  ;;  %v639_v22 = vld [vmem:[#allocation5 + $0x58] sm:$0xff]   ;;  %v642_v26 = vld [vmem:[#allocation5 + $0x40] sm:$0xff]   ;;  %v651_v28 = vld [vmem:[#allocation7 + $0x8] sm:$0xff]  }
  0x3b   :  { %580 = vmatpush3.bf16.msra.mxu1 %v646_v10  ;;  %v652_v29 = vld [vmem:[#allocation7] sm:$0xff]   ;;  %v526_v30 = vld [vmem:[%s896_s2] ss:$0 sm:$0xff]  ;;  %v653_v36 = vld [vmem:[#allocation8 + $0x38] sm:$0xff]  }
  0x3c   :  { %581 = vmatprep.subr.bf16.mxu1 %v782_v1  ;;  %v654_v39 = vld [vmem:[#allocation8 + $0x30] sm:$0xff]   ;;  %v655_v40 = vld [vmem:[#allocation8 + $0x28] sm:$0xff]   ;;  %v656_v41 = vld [vmem:[#allocation8 + $0x20] sm:$0xff]  }
  0x3d   :  { %233 = vmatpush1.bf16.msra.mxu0 %v632_v4  ;;  %v657_v42 = vld [vmem:[#allocation8 + $0x18] sm:$0xff]   ;;  %v658_v43 = vld [vmem:[#allocation8 + $0x10] sm:$0xff]   ;;  %v659_v44 = vld [vmem:[#allocation8 + $0x8] sm:$0xff]  }
  0x3e   :  { %234 = vmatprep.subr.bf16.mxu0 %v781_v0  ;;  %v660_v45 = vld [vmem:[#allocation8] sm:$0xff]   ;;  %v541_v46 = vld [vmem:[%s898_s4] ss:$0 sm:$0xff] }
  0x3f   :  { %582 = vmatpush3.bf16.msra.mxu1 %v647_v15  ;;  %v550_v54 = vld [vmem:[%s900_s6] ss:$0 sm:$0xff] }
  0x40   :  { %583 = vmatprep.subr.bf16.mxu1 %v782_v1 }
  0x41   :  { %235 = vmatpush1.bf16.msra.mxu0 %v633_v5 }
  0x42   :  { %236 = vmatprep.subr.bf16.mxu0 %v781_v0 }
  0x43   :  { %584 = vmatpush3.bf16.msra.mxu1 %v648_v16 }
  0x44   :  { %585 = vmatprep.subr.bf16.mxu1 %v782_v1 }
  0x45   :  { %237 = vmatpush1.bf16.msra.mxu0 %v634_v6 }
  0x46   :  { %238 = vmatprep.subr.bf16.mxu0 %v781_v0 }
  0x47   :  { %586 = vmatpush3.bf16.msra.mxu1 %v649_v19 }
  0x48   :  { %587 = vmatprep.subr.bf16.mxu1 %v782_v1 }
  0x49   :  { %239 = vmatpush1.bf16.msra.mxu0 %v635_v11 }
  0x4a   :  { %240 = vmatprep.subr.bf16.mxu0 %v781_v0 }
  0x4b   :  { %588 = vmatpush3.bf16.msra.mxu1 %v650_v21 }
  0x4c   :  { %589 = vmatprep.subr.bf16.mxu1 %v782_v1 }
  0x4d   :  { %241 = vmatpush1.bf16.msra.mxu0 %v636_v13 }
  0x4e   :  { %242 = vmatprep.subr.bf16.mxu0 %v781_v0 }
  0x4f   :  { %590 = vmatpush3.bf16.msra.mxu1 %v651_v28 }
  0x50   :  { %591 = vmatprep.subr.bf16.mxu1 %v782_v1 }
  0x51   :  { %243 = vmatpush1.bf16.msra.mxu0 %v637_v17 }
  0x52   :  { %250 = vmatprep.subr.bf16.mxu0 %v781_v0 }
  0x53   :  { %592 = vmatpush3.bf16.msra.mxu1 %v652_v29 }
  0x54   :  { %597 = vmatprep.subr.bf16.mxu1 %v782_v1 }
  0x55   :  { %251 = vmatpush2.bf16.msra.mxu0 %v226_v20 }
  0x56   :  { %252 = vmatprep.subr.bf16.mxu0 %v781_v0 }
  0x59   :  { %253 = vmatpush2.bf16.msra.mxu0 %v639_v22 }
  0x5a   :  { %254 = vmatprep.subr.bf16.mxu0 %v781_v0 }
  0x5d   :  { %255 = vmatpush2.bf16.msra.mxu0 %v640_v23 }
  0x5e   :  { %256 = vmatprep.subr.bf16.mxu0 %v781_v0 }
  0x61   :  { %257 = vmatpush2.bf16.msra.mxu0 %v641_v24 }
  0x62   :  { %258 = vmatprep.subr.bf16.mxu0 %v781_v0 }
  0x65   :  { %259 = vmatpush2.bf16.msra.mxu0 %v642_v26 }
  0x68   :  { %261 = vmatmul.mubr.bf16.vlgmr.msra.gmra.mxu0 %v111_v27 }
 0x128   :  { %v262_v31 = vpop.f32.mrf.mxu0 }
 0x129   :  { %v263_v32 = vadd.f32 %v526_v30, %v262_v31 }
 0x12a   :  { %v264_v33 = vpop.f32.mrf.mxu0 }
 0x12b   :  { %v268_v34 = vmax.f32 %v263_v32, 0.0 }
 0x12c   :  { %v265_v35 = vpop.f32.mrf.mxu0 }
 0x12d   :  { %v269_v37 = vpack.c.bf16 %v268_v34, %v268_v34 }
 0x12e   :  { %v266_v38 = vpop.f32.mrf.mxu0 }
 0x12f   :  { %594 = vmatmul.mubr.bf16.vlgmr.msra.gmra.mxu1 %v269_v37 }
 0x130   :  { %598 = vmatpush3.bf16.msra.mxu1 %v653_v36  ;;  %613 = vmatprep.mubr.msk.bf16.mxu1 %vm783_vm2, %v782_v1 }
 0x131   :  { %599 = vmatprep.subr.bf16.mxu1 %v782_v1 }
 0x134   :  { %600 = vmatpush3.bf16.msra.mxu1 %v654_v39 }
 0x135   :  { %601 = vmatprep.subr.bf16.mxu1 %v782_v1 }
 0x138   :  { %602 = vmatpush3.bf16.msra.mxu1 %v655_v40 }
 0x139   :  { %603 = vmatprep.subr.bf16.mxu1 %v782_v1 }
 0x13c   :  { %604 = vmatpush3.bf16.msra.mxu1 %v656_v41 }
 0x13d   :  { %605 = vmatprep.subr.bf16.mxu1 %v782_v1 }
 0x140   :  { %606 = vmatpush3.bf16.msra.mxu1 %v657_v42 }
 0x141   :  { %607 = vmatprep.subr.bf16.mxu1 %v782_v1 }
 0x144   :  { %608 = vmatpush3.bf16.msra.mxu1 %v658_v43 }
 0x145   :  { %609 = vmatprep.subr.bf16.mxu1 %v782_v1 }
 0x148   :  { %610 = vmatpush3.bf16.msra.mxu1 %v659_v44 }
 0x149   :  { %611 = vmatprep.subr.bf16.mxu1 %v782_v1 }
 0x14c   :  { %612 = vmatpush3.bf16.msra.mxu1 %v660_v45 }
 0x1ef   :  { %v375_v47 = vpop.f32.mrf.mxu1 }
 0x1f0   :  { %v376_v48 = vadd.f32 %v541_v46, %v375_v47 }
 0x1f1   :  { %v595_v49 = vpop.f32.mrf.mxu1 }
 0x1f2   :  { %v381_v50 = vmax.f32 %v376_v48, 0.0 }
 0x1f3   :  { %v378_v51 = vpop.f32.mrf.mxu1 }
 0x1f4   :  { %v382_v52 = vpack.c.bf16 %v381_v50, %v381_v50 }
 0x1f5   :  { %v596_v53 = vpop.f32.mrf.mxu1 }
 0x1f6   :  { %614 = vmatmul.mubr.bf16.vlgmr.msra.gmra.mxu1 %v382_v52 }
 0x2b6   :  { %v488_v55 = vpop.f32.mrf.mxu1 }
 0x2b7   :  { %v489_v56 = vadd.f32 %v550_v54, %v488_v55 }
 0x2b8   :  { %v615_v57 = vpop.f32.mrf.mxu1 }
 0x2b9   :  { %494 = vmax.xlane.f32.xlu0 %v489_v56 }
 0x2ba   :  { %v491_v58 = vpop.f32.mrf.mxu1 }
 0x2bc   :  { %v616_v59 = vpop.f32.mrf.mxu1 }
 0x342   :  { %v495_v60 = vpop.xlane.xlu0 %494 }
 0x343   :  { %v496_v61 = vsub.f32 %v489_v56, %v495_v60 }
 0x345   :  { %v497_v62 = vmul.f32 1.442695, %v496_v61 }
 0x347   :  { %661 = vpow2.f32 %v497_v62 }
 0x354   :  { %v662_v63 = vpop.eup %661 }
 0x355   :  { %499 = vadd.xlane.f32.xlu0 %v662_v63 }
 0x3de   :  { %v500_v0 = vpop.xlane.xlu0 %499 }
 0x3df   :  { %663 = vrcp.f32 %v500_v0 }
 0x3ec   :  { %v664_v1 = vpop.eup %663 }
 0x3ed   :  { %v502_v2 = vmul.f32 %v664_v1, %v500_v0 }
 0x3ef   :  { %v503_v3 = vsub.f32 2.0, %v502_v2 }
 0x3f1   :  { %v504_v4 = vmul.f32 %v664_v1, %v503_v3 }
 0x3f3   :  { %v505_v5 = vmul.f32 %v662_v63, %v504_v4 }
 0x3f5   :  { %506 = vst [vmem:[#allocation10] sm:$0xff] %v505_v5 }
 0x3f6   :  { %511 = vsyncadd [#allocation4], 96  ;;  %s784_s4 = smov [#allocation10]  }
 0x3f7   :  { %s512_s6 = sshll.u32 %s784_s4, 4  ;;  %s513_s6 = int_to_ptr.vmem [resolvable:$true] %s512_s6 }
 0x3f8   :  { %s747_s25 = scalar_lea.vmem %s513_s6, 32  ;;  %s751_s26 = scalar_lea.vmem %s513_s6, 128 }
 0x3f9   :  { %p748_p6 = scmp.ne.s32.totalorder %s513_s6, %s747_s25  ;;  %p752_p7 = scmp.lt.s32.totalorder %s513_s6, %s513_s6 }
 0x3fa   :  { %p753_p8 = scmp.lt.s32.totalorder %s751_s26, %s747_s25 }
 0x3fc   :  { %p754_p9 = por %p753_p8, %p752_p7 }
 0x3fe   :  { %p755_p10 = pnand %p754_p9, %p748_p6 }
 0x400   :  { %758 = shalt.err (!%p755_p10)
}
 0x401   :  { %s785_s27 = smov 32   ;;  %s786_s28 = smov 2  }
 0x402   :  { %518 = dma.vmem_to_hbm [thread:$0]  %s513_s6, 32, %s901_s7, [#allocation4], %s785_s27, %s785_s27, %s786_s28  }
 0x403   :  { %773 = dma.done.wait [#allocation4], 128  }
 0x404   :  { %774 = vsyncadd [#allocation4], 4294967168 }
 0x405   :  { %522 = vsyncpa [#allocation3], 1 }
 0x406   :  { %523 = vsyncpa [#allocation6], 1 }
 0x407   :  { %524 = vsyncpa [#allocation9], 1 }
 0x408   :  { %525 = vsyncpa [#allocation4], 1 }

</bundles_post_ra>
